<compile_context>
chip_gen: v6e
topology: v6e:2x2x1
jax: 0.10.0
libtpu: 0.0.40
codegen_flags: <defaults>
</compile_context>

<pallas_src>
import functools

import jax
import jax.numpy as jnp
from jax.experimental import pallas as pl
from jax.experimental.pallas import tpu as pltpu


def _round_up(x, m):
    return ((x + m - 1) // m) * m


def _fused_mlp_kernel(*refs, n_hidden):
    """refs = (x, w0, b0, ..., w_{n-1}, b_{n-1}, w_head, b_head_smem, out)."""
    x_ref = refs[0]
    o_ref = refs[-1]
    params = refs[1:-1]

    h = x_ref[...].astype(jnp.float32)              # (TB, IN_pad)

    # Hidden layers: MXU matmul + bias + ReLU, all in vregs / VMEM.
    for l in range(n_hidden):
        w = params[2 * l][...]                      # (in_l, out_l), pre-transposed
        b = params[2 * l + 1][...]                  # (1, out_l), f32
        h = jnp.dot(h.astype(w.dtype), w, preferred_element_type=jnp.float32)
        h = jnp.maximum(h + b.astype(jnp.float32), 0.0)

    # Head (out_features == 1), lane-dense: (1,H) x (TB,H)^T -> (1, TB) row.
    # Avoids a lane-1 output tile (masked stores) and the cross-lane reduce.
    w_head = params[-2][...]                        # (1, H_last)
    b_head = params[-1][0, 0]                       # scalar head bias from SMEM
    row = jax.lax.dot_general(
        w_head, h.astype(w_head.dtype),
        dimension_numbers=(((1,), (1,)), ((), ())),
        preferred_element_type=jnp.float32)         # (1, TB)
    o_ref[...] = (row + b_head).astype(o_ref.dtype)  # single unmasked row store


def _choose_tiling(batch):
    """Return (TB, B_pad).

    Small batches: one full-extent block (no (8,128) issues, grid == 1).
    batch >= 256: tile rows in multiples of 128 with >= 2 tiles so both v7x
    TensorCores get work; batch is zero-padded up to the tile grid.
    """
    if batch < 256:
        b_pad = _round_up(batch, 8)
        return b_pad, b_pad
    b_pad = _round_up(batch, 128)
    tb = 512
    while tb > 128 and (b_pad % tb != 0 or b_pad // tb < 2):
        tb -= 128
    return tb, b_pad


def init_mlp_params(key, input_size, hiddens, param_dtype=jnp.float32):
    """PyTorch nn.Linear init U(-1/sqrt(fan_in), 1/sqrt(fan_in)).

    Hidden weights are stored PRE-TRANSPOSED as (in_features, out_features);
    biases as (1, out_features) in f32.  The first layer's input dim is
    zero-padded to a multiple of 128 (zero rows) so the first MXU matmul is
    lane-aligned; the wrapper zero-pads x to match, keeping the math exact.
    The head weight keeps the PyTorch (1, last_hidden) layout.  Use
    param_dtype=jnp.bfloat16 for wide (>=256) layers to feed the bf16 MXU.
    """
    in_pad = _round_up(input_size, 128)
    hidden_params = []
    last, last_pad = input_size, in_pad
    for out_dim in hiddens:
        key, kw, kb = jax.random.split(key, 3)
        bound = 1.0 / float(last) ** 0.5
        w = jax.random.uniform(kw, (last, out_dim), jnp.float32, -bound, bound)
        if last_pad > last:
            w = jnp.pad(w, ((0, last_pad - last), (0, 0)))
        b = jax.random.uniform(kb, (1, out_dim), jnp.float32, -bound, bound)
        hidden_params.append((w.astype(param_dtype), b))
        last, last_pad = out_dim, out_dim
    key, kw, kb = jax.random.split(key, 3)
    bound = 1.0 / float(last) ** 0.5
    w_head = jax.random.uniform(kw, (1, last), jnp.float32, -bound, bound)
    if last_pad > last:
        w_head = jnp.pad(w_head, ((0, 0), (0, last_pad - last)))
    b_head = jax.random.uniform(kb, (1, 1), jnp.float32, -bound, bound)
    return (hidden_params, (w_head.astype(param_dtype), b_head))


def mlp_regressor_forward(x, params):
    """x: (batch, *any) -> (batch, 1).  One fused Pallas call."""
    hidden, (w_head, b_head) = params
    B = x.shape[0]
    h = x.reshape(B, -1).astype(jnp.float32)        # flatten is plain-JAX glue
    in_feats = h.shape[1]
    in_pad = hidden[0][0].shape[0] if hidden else w_head.shape[1]
    if in_pad > in_feats:                            # lane-align first matmul
        h = jnp.pad(h, ((0, 0), (0, in_pad - in_feats)))

    TB, B_pad = _choose_tiling(B)
    if B_pad > B:
        h = jnp.pad(h, ((0, B_pad - B), (0, 0)))
    grid = (B_pad // TB,)

    flat_params = []
    for (w, b) in hidden:
        flat_params += [w, b]
    flat_params += [w_head, b_head]

    kernel = functools.partial(_fused_mlp_kernel, n_hidden=len(hidden))

    # VMEM budget + cost hint.
    param_bytes = sum(int(p.size) * p.dtype.itemsize for p in flat_params)
    widths = [in_pad] + [w.shape[1] for (w, _) in hidden]
    need = (param_bytes
            + 2 * TB * in_pad * 4                 # double-buffered input tile
            + 2 * 8 * max(TB, 128) * 4            # (8,128)-padded output tile
            + 3 * TB * max(widths) * 4)           # live activations
    vmem_limit = int(min(max(2 * need + (4 << 20), 16 << 20), 64 << 20))
    flops = 2 * B_pad * (sum(w.shape[0] * w.shape[1] for (w, _) in hidden)
                         + w_head.shape[1])
    cost = pl.CostEstimate(
        flops=flops, transcendentals=0,
        bytes_accessed=param_bytes + B_pad * in_pad * 4 + B_pad * 4)

    def call(single_buffer_weights):
        def const_spec(shape):
            # Weights/biases never change block index; single-buffer them so
            # they are VMEM-resident once (halves weight VMEM on v7x).
            if single_buffer_weights:
                return pl.BlockSpec(shape, lambda i: (0, 0),
                                    pipeline_mode=pl.Buffered(1))
            return pl.BlockSpec(shape, lambda i: (0, 0))

        in_specs = [pl.BlockSpec((TB, in_pad), lambda i: (i, 0))]
        for (w, b) in hidden:
            in_specs += [const_spec(w.shape), const_spec(b.shape)]
        in_specs += [const_spec(w_head.shape),
                     pl.BlockSpec(memory_space=pltpu.MemorySpace.SMEM)]

        return pl.pallas_call(
            kernel,
            out_shape=jax.ShapeDtypeStruct((1, B_pad), jnp.float32),
            grid=grid,
            in_specs=in_specs,
            out_specs=pl.BlockSpec((1, TB), lambda i: (0, i)),
            compiler_params=pltpu.CompilerParams(
                dimension_semantics=("parallel",),
                vmem_limit_bytes=vmem_limit),
            cost_estimate=cost,
        )(h, *flat_params)

    if hasattr(pl, "Buffered"):
        try:
            out = call(True)
        except Exception:           # fallback: default double-buffered specs
            out = call(False)
    else:
        out = call(False)

    # (1, B_pad) lane-dense row -> (B, 1) column (drop batch padding).
    return out.reshape(B_pad, 1)[:B]


def mlp_regressor_ref(x, params):
    """Plain-JAX reference (full-precision matmuls)."""
    hidden, (w_head, b_head) = params
    B = x.shape[0]
    h = x.reshape(B, -1).astype(jnp.float32)
    for (w, b) in hidden:
        if h.shape[1] < w.shape[0]:
            h = jnp.pad(h, ((0, 0), (0, w.shape[0] - h.shape[1])))
        h = jnp.maximum(
            jnp.dot(h, w.astype(jnp.float32),
                    precision=jax.lax.Precision.HIGHEST) + b, 0.0)
    if h.shape[1] < w_head.shape[1]:
        h = jnp.pad(h, ((0, 0), (0, w_head.shape[1] - h.shape[1])))
    return jnp.dot(h, w_head.astype(jnp.float32).T,
                   precision=jax.lax.Precision.HIGHEST) + b_head


if __name__ == "__main__":
    key = jax.random.PRNGKey(0)
    k_in, k_param = jax.random.split(key)

    batch = 8
    input_shape = (4, 8)            # flattens to input_size = 32
    input_size = 32
    hiddens = (128,)

    x = jax.random.normal(k_in, (batch,) + input_shape, jnp.float32)
    params = init_mlp_params(k_param, input_size, hiddens)

    out = mlp_regressor_forward(x, params)
    out = jax.block_until_ready(out)

    ref = mlp_regressor_ref(x, params)
    assert out.shape == (batch, 1), out.shape
    assert jnp.allclose(out, ref, atol=1e-4, rtol=1e-4), (
        float(jnp.max(jnp.abs(out - ref))))

    print("KERNEL_OK")
</pallas_src>

<mosaic_0001>
module attributes {stable_mosaic.version = 11 : i64} {
  func.func @_fused_mlp_kernel(%arg0: i32, %arg1: memref<8x128xf32, #tpu.memory_space<vmem>>, %arg2: memref<128x128xf32, #tpu.memory_space<vmem>>, %arg3: memref<1x128xf32, #tpu.memory_space<vmem>>, %arg4: memref<1x128xf32, #tpu.memory_space<vmem>>, %arg5: memref<1x1xf32, #tpu.memory_space<smem>>, %arg6: memref<1x8xf32, #tpu.memory_space<vmem>>) attributes {dimension_semantics = [#tpu.dimension_semantics<parallel>], iteration_bounds = array<i64: 1>, scalar_prefetch = 0 : i64, scratch_operands = 0 : i64, tpu.core_type = #tpu.core_type<tc>, window_params = [{transform_indices = @transform_0, window_bounds = array<i64: 8, 128>}, {pipeline_mode = #tpu.pipeline_mode<synchronous>, transform_indices = @transform_1, window_bounds = array<i64: 128, 128>}, {pipeline_mode = #tpu.pipeline_mode<synchronous>, transform_indices = @transform_2, window_bounds = array<i64: 1, 128>}, {pipeline_mode = #tpu.pipeline_mode<synchronous>, transform_indices = @transform_3, window_bounds = array<i64: 1, 128>}, {transform_indices = @transform_4, window_bounds = array<i64: 1, 1>}, {transform_indices = @transform_5, window_bounds = array<i64: 1, 8>}]} {
    %c0 = arith.constant 0 : index
    %c0_0 = arith.constant 0 : index
    %0 = vector.load %arg1[%c0, %c0_0] : memref<8x128xf32, #tpu.memory_space<vmem>>, vector<8x128xf32>
    %c0_1 = arith.constant 0 : index
    %c0_2 = arith.constant 0 : index
    %1 = vector.load %arg2[%c0_1, %c0_2] : memref<128x128xf32, #tpu.memory_space<vmem>>, vector<128x128xf32>
    %c0_3 = arith.constant 0 : index
    %c0_4 = arith.constant 0 : index
    %2 = vector.load %arg3[%c0_3, %c0_4] : memref<1x128xf32, #tpu.memory_space<vmem>>, vector<1x128xf32>
    %cst = arith.constant dense<0.000000e+00> : vector<8x128xf32>
    %3 = tpu.matmul %0, %1, %cst {dimension_numbers = #tpu.dot_dimension_numbers<[1], [0], [0], [1], [0, 0, 1, 1], [], []>} : vector<8x128xf32>, vector<128x128xf32>, vector<8x128xf32> -> vector<8x128xf32>
    %4 = vector.broadcast %2 : vector<1x128xf32> to vector<8x128xf32>
    %5 = arith.addf %3, %4 : vector<8x128xf32>
    %cst_5 = arith.constant 0.000000e+00 : f32
    %6 = vector.broadcast %cst_5 : f32 to vector<8x128xf32>
    %7 = arith.maximumf %5, %6 : vector<8x128xf32>
    %c0_6 = arith.constant 0 : index
    %c0_7 = arith.constant 0 : index
    %8 = vector.load %arg4[%c0_6, %c0_7] : memref<1x128xf32, #tpu.memory_space<vmem>>, vector<1x128xf32>
    %c0_8 = arith.constant 0 : index
    %c0_9 = arith.constant 0 : index
    %9 = memref.load %arg5[%c0_8, %c0_9] : memref<1x1xf32, #tpu.memory_space<smem>>
    %cst_10 = arith.constant dense<0.000000e+00> : vector<1x8xf32>
    %10 = tpu.matmul %8, %7, %cst_10 {dimension_numbers = #tpu.dot_dimension_numbers<[1], [1], [0], [0], [0, 0, 1, 0], [], []>} : vector<1x128xf32>, vector<8x128xf32>, vector<1x8xf32> -> vector<1x8xf32>
    %11 = vector.broadcast %9 : f32 to vector<1x8xf32>
    %12 = arith.addf %10, %11 : vector<1x8xf32>
    %c0_11 = arith.constant 0 : index
    %c0_12 = arith.constant 0 : index
    %13 = vector.load %arg6[%c0_11, %c0_12] : memref<1x8xf32, #tpu.memory_space<vmem>>, vector<1x8xf32>
    tpu.vector_store %arg6[%c0_11, %c0_12], %12 {strides = array<i32>} : memref<1x8xf32, #tpu.memory_space<vmem>>, vector<1x8xf32>,
    return
  }
  func.func @transform_0(%arg0: i32) -> (i32, i32) {
    %c0_i32 = arith.constant 0 : i32
    %c0_i32_0 = arith.constant 0 : i32
    return %arg0, %c0_i32 : i32, i32
  }
  func.func @transform_1(%arg0: i32) -> (i32, i32) {
    %c0_i32 = arith.constant 0 : i32
    %c0_i32_0 = arith.constant 0 : i32
    %c0_i32_1 = arith.constant 0 : i32
    return %c0_i32, %c0_i32_0 : i32, i32
  }
  func.func @transform_2(%arg0: i32) -> (i32, i32) {
    %c0_i32 = arith.constant 0 : i32
    %c0_i32_0 = arith.constant 0 : i32
    %c0_i32_1 = arith.constant 0 : i32
    return %c0_i32, %c0_i32_0 : i32, i32
  }
  func.func @transform_3(%arg0: i32) -> (i32, i32) {
    %c0_i32 = arith.constant 0 : i32
    %c0_i32_0 = arith.constant 0 : i32
    %c0_i32_1 = arith.constant 0 : i32
    return %c0_i32, %c0_i32_0 : i32, i32
  }
  func.func @transform_4(%arg0: i32) -> (i32, i32) {
    %c0_i32 = arith.constant 0 : i32
    %c0_i32_0 = arith.constant 0 : i32
    %c0_i32_1 = arith.constant 0 : i32
    return %c0_i32, %c0_i32_0 : i32, i32
  }
  func.func @transform_5(%arg0: i32) -> (i32, i32) {
    %c0_i32 = arith.constant 0 : i32
    %c0_i32_0 = arith.constant 0 : i32
    return %c0_i32, %arg0 : i32, i32
  }
}

module attributes {stable_mosaic.version = 11 : i64} {
  func.func @_fused_mlp_kernel(%arg0: i32, %arg1: memref<8x128xf32, #tpu.memory_space<vmem>>, %arg2: memref<128x128xf32, #tpu.memory_space<vmem>>, %arg3: memref<1x128xf32, #tpu.memory_space<vmem>>, %arg4: memref<1x128xf32, #tpu.memory_space<vmem>>, %arg5: memref<1x1xf32, #tpu.memory_space<smem>>, %arg6: memref<1x8xf32, #tpu.memory_space<vmem>>) attributes {dimension_semantics = [#tpu.dimension_semantics<parallel>], iteration_bounds = array<i64: 1>, scalar_prefetch = 0 : i64, scratch_operands = 0 : i64, tpu.core_type = #tpu.core_type<tc>, window_params = [{transform_indices = @transform_0, window_bounds = array<i64: 8, 128>}, {pipeline_mode = #tpu.pipeline_mode<synchronous>, transform_indices = @transform_1, window_bounds = array<i64: 128, 128>}, {pipeline_mode = #tpu.pipeline_mode<synchronous>, transform_indices = @transform_2, window_bounds = array<i64: 1, 128>}, {pipeline_mode = #tpu.pipeline_mode<synchronous>, transform_indices = @transform_3, window_bounds = array<i64: 1, 128>}, {transform_indices = @transform_4, window_bounds = array<i64: 1, 1>}, {transform_indices = @transform_5, window_bounds = array<i64: 1, 8>}]} {
    %c0 = arith.constant 0 : index
    %c0_0 = arith.constant 0 : index
    %0 = vector.load %arg1[%c0, %c0_0] : memref<8x128xf32, #tpu.memory_space<vmem>>, vector<8x128xf32>
    %c0_1 = arith.constant 0 : index
    %c0_2 = arith.constant 0 : index
    %1 = vector.load %arg2[%c0_1, %c0_2] : memref<128x128xf32, #tpu.memory_space<vmem>>, vector<128x128xf32>
    %c0_3 = arith.constant 0 : index
    %c0_4 = arith.constant 0 : index
    %2 = vector.load %arg3[%c0_3, %c0_4] : memref<1x128xf32, #tpu.memory_space<vmem>>, vector<1x128xf32>
    %cst = arith.constant dense<0.000000e+00> : vector<8x128xf32>
    %3 = tpu.matmul %0, %1, %cst {dimension_numbers = #tpu.dot_dimension_numbers<[1], [0], [0], [1], [0, 0, 1, 1], [], []>} : vector<8x128xf32>, vector<128x128xf32>, vector<8x128xf32> -> vector<8x128xf32>
    %4 = vector.broadcast %2 : vector<1x128xf32> to vector<8x128xf32>
    %5 = arith.addf %3, %4 : vector<8x128xf32>
    %cst_5 = arith.constant 0.000000e+00 : f32
    %6 = vector.broadcast %cst_5 : f32 to vector<8x128xf32>
    %7 = arith.maximumf %5, %6 : vector<8x128xf32>
    %c0_6 = arith.constant 0 : index
    %c0_7 = arith.constant 0 : index
    %8 = vector.load %arg4[%c0_6, %c0_7] : memref<1x128xf32, #tpu.memory_space<vmem>>, vector<1x128xf32>
    %c0_8 = arith.constant 0 : index
    %c0_9 = arith.constant 0 : index
    %9 = memref.load %arg5[%c0_8, %c0_9] : memref<1x1xf32, #tpu.memory_space<smem>>
    %cst_10 = arith.constant dense<0.000000e+00> : vector<1x8xf32>
    %10 = tpu.matmul %8, %7, %cst_10 {dimension_numbers = #tpu.dot_dimension_numbers<[1], [1], [0], [0], [0, 0, 1, 0], [], []>} : vector<1x128xf32>, vector<8x128xf32>, vector<1x8xf32> -> vector<1x8xf32>
    %11 = vector.broadcast %9 : f32 to vector<1x8xf32>
    %12 = arith.addf %10, %11 : vector<1x8xf32>
    %c0_11 = arith.constant 0 : index
    %c0_12 = arith.constant 0 : index
    %13 = vector.load %arg6[%c0_11, %c0_12] : memref<1x8xf32, #tpu.memory_space<vmem>>, vector<1x8xf32>
    tpu.vector_store %arg6[%c0_11, %c0_12], %12 {strides = array<i32>} : memref<1x8xf32, #tpu.memory_space<vmem>>, vector<1x8xf32>,
    return
  }
  func.func @transform_0(%arg0: i32) -> (i32, i32) {
    %c0_i32 = arith.constant 0 : i32
    %c0_i32_0 = arith.constant 0 : i32
    return %arg0, %c0_i32 : i32, i32
  }
  func.func @transform_1(%arg0: i32) -> (i32, i32) {
    %c0_i32 = arith.constant 0 : i32
    %c0_i32_0 = arith.constant 0 : i32
    %c0_i32_1 = arith.constant 0 : i32
    return %c0_i32, %c0_i32_0 : i32, i32
  }
  func.func @transform_2(%arg0: i32) -> (i32, i32) {
    %c0_i32 = arith.constant 0 : i32
    %c0_i32_0 = arith.constant 0 : i32
    %c0_i32_1 = arith.constant 0 : i32
    return %c0_i32, %c0_i32_0 : i32, i32
  }
  func.func @transform_3(%arg0: i32) -> (i32, i32) {
    %c0_i32 = arith.constant 0 : i32
    %c0_i32_0 = arith.constant 0 : i32
    %c0_i32_1 = arith.constant 0 : i32
    return %c0_i32, %c0_i32_0 : i32, i32
  }
  func.func @transform_4(%arg0: i32) -> (i32, i32) {
    %c0_i32 = arith.constant 0 : i32
    %c0_i32_0 = arith.constant 0 : i32
    %c0_i32_1 = arith.constant 0 : i32
    return %c0_i32, %c0_i32_0 : i32, i32
  }
  func.func @transform_5(%arg0: i32) -> (i32, i32) {
    %c0_i32 = arith.constant 0 : i32
    %c0_i32_0 = arith.constant 0 : i32
    return %c0_i32, %arg0 : i32, i32
  }
}

</mosaic_0001>

<bundles_post_ra>
// kernel: tpu_custom_call.1
= control target key start
LH: loop header
LB: loop body
LE: loop exit
PB: predicated region body
PF: predicated region fallthrough
CT: control target
= control target key end

     0   :  { %11 = vsyncpa [#allocation4], 0  ;;  %s422_s0 = inlined_call_operand.hbm [shape: f32[8,128], index: 0, kind: input, shape index: {}]   ;;  %s423_s1 = inlined_call_operand.hbm [shape: f32[128,128], index: 1, kind: input, shape index: {}]   ;;  %s424_s2 = inlined_call_operand.vmem [shape: f32[1,128], index: 2, kind: input, shape index: {}]   ;;  %s425_s3 = inlined_call_operand.vmem [shape: f32[1,128], index: 3, kind: input, shape index: {}]   ;;  %s426_s4 = inlined_call_operand.<no memory space> [shape: f32[1,1], index: 4, kind: input, shape index: {}]   ;;  %s427_s5 = inlined_call_operand.hbm [shape: f32[1,8], index: 5, kind: output, shape index: {}]  }
   0x1   :  { %12 = vsyncpa [#allocation7], 0 }
   0x2   :  { %13 = vsyncpa [#allocation5], 0  ;;  %s367_s18 = smov [#allocation3]   ;;  %s368_s20 = smov [#allocation6]  }
   0x3   :  { %s20_s19 = sshll.u32 %s367_s18, 4  ;;  %s29_s21 = sshll.u32 %s368_s20, 4  ;;  %s21_s19 = int_to_ptr.vmem [resolvable:$true] %s20_s19  ;;  %s30_s21 = int_to_ptr.vmem [resolvable:$true] %s29_s21 }
   0x4   :  { %s309_s22 = scalar_lea.vmem %s21_s19, 128  ;;  %p314_p1 = scmp.lt.s32.totalorder %s21_s19, %s21_s19 }
   0x5   :  { %p310_p0 = scmp.ne.s32.totalorder %s21_s19, %s309_s22  ;;  %p315_p2 = scmp.lt.s32.totalorder %s309_s22, %s309_s22 }
   0x7   :  { %p316_p3 = por %p315_p2, %p314_p1 }
   0x9   :  { %p317_p4 = pnand %p316_p3, %p310_p0 }
   0xb   :  { %320 = shalt.err (!%p317_p4)
}
   0xc   :  { %23 = dma.hbm_to_vmem [thread:$0]  %s422_s0, 128, %s21_s19, [#allocation4]  }
   0xd   :  { %s329_s25 = scalar_lea.vmem %s30_s21, 2048  ;;  %p334_p6 = scmp.lt.s32.totalorder %s30_s21, %s30_s21 }
   0xe   :  { %p330_p5 = scmp.ne.s32.totalorder %s30_s21, %s329_s25  ;;  %p335_p7 = scmp.lt.s32.totalorder %s329_s25, %s329_s25 }
  0x10   :  { %p336_p8 = por %p335_p7, %p334_p6 }
  0x12   :  { %p337_p9 = pnand %p336_p8, %p330_p5 }
  0x14   :  { %340 = shalt.err (!%p337_p9)
}
  0x15   :  { %s369_s26 = smov 128   ;;  %s370_s27 = smov 8  }
  0x16   :  { %35 = dma.hbm_to_vmem [thread:$0]  %s423_s1, 2048, %s30_s21, [#allocation7], %s369_s26, %s369_s26, %s370_s27  }
  0x17   :  { %361 = dma.done.wait [#allocation4], 128  }
  0x18   :  { %362 = vsyncadd [#allocation4], 4294967168 }
  0x19   :  { %363 = dma.done.wait [#allocation7], 2048  }
  0x1a   :  { %364 = vsyncadd [#allocation7], 4294965248  ;;  %v371_v0 = vmov 0.0   ;;  %vm372_vm0 = vmmov 0   ;;  %v64_v1 = vld [vmem:[#allocation6 + $0x78] sm:$0xff]  ;;  %v63_v2 = vld [vmem:[#allocation6 + $0x70] sm:$0xff]  ;;  %v145_v24 = vstv %s426_s4 }
  0x1b   :  { %254 = vmatprep.subr.mxu0 %v371_v0  ;;  %286 = vmatprep.mubr.msk.f32.mxu0 %vm372_vm0, %v371_v0  ;;  %v62_v3 = vld [vmem:[#allocation6 + $0x68] sm:$0xff]  ;;  %v61_v4 = vld [vmem:[#allocation6 + $0x60] sm:$0xff]  ;;  %v60_v5 = vld [vmem:[#allocation6 + $0x58] sm:$0xff]  ;;  %s373_s9 = smov [#allocation8]   ;;  %vm216_vm1 = vcmask 57344  }
  0x1c   :  { %289 = vmatprep.subr.mxu1 %v371_v0  ;;  %291 = vmatprep.mubr.msk.f32.mxu1 %vm372_vm0, %v371_v0  ;;  %v59_v6 = vld [vmem:[#allocation6 + $0x50] sm:$0xff]  ;;  %v58_v7 = vld [vmem:[#allocation6 + $0x48] sm:$0xff]  ;;  %v57_v8 = vld [vmem:[#allocation6 + $0x40] sm:$0xff]  ;;  %s224_s10 = sshll.u32 %s373_s9, 4  ;;  %s225_s10 = int_to_ptr.vmem [resolvable:$true] %s224_s10 }
  0x1d   :  { %255 = vmatpush3.msra.mxu0 %v64_v1  ;;  %v56_v9 = vld [vmem:[#allocation6 + $0x38] sm:$0xff]  ;;  %v55_v10 = vld [vmem:[#allocation6 + $0x30] sm:$0xff]  ;;  %v54_v11 = vld [vmem:[#allocation6 + $0x28] sm:$0xff]  ;;  %s345_s11 = scalar_lea.vmem %s225_s10, 32  ;;  %p346_p11 = scmp.lt.s32.totalorder %s225_s10, %s225_s10 }
  0x1e   :  { %256 = vmatprep.subr.mxu0 %v371_v0  ;;  %v53_v12 = vld [vmem:[#allocation6 + $0x20] sm:$0xff]  ;;  %v52_v13 = vld [vmem:[#allocation6 + $0x18] sm:$0xff]  ;;  %v51_v14 = vld [vmem:[#allocation6 + $0x10] sm:$0xff] }
  0x1f   :  { %257 = vmatpush3.msra.mxu0 %v63_v2  ;;  %v50_v15 = vld [vmem:[#allocation6 + $0x8] sm:$0xff]  ;;  %v49_v16 = vld [vmem:[#allocation6] sm:$0xff]  ;;  %v48_v17 = vld [vmem:[#allocation3] sm:$0xff] }
  0x20   :  { %258 = vmatprep.subr.mxu0 %v371_v0  ;;  %v234_v18 = vld [vmem:[%s424_s2] ss:$0 sm:$0xff]  ;;  %s341_s2 = scalar_lea.vmem %s225_s10, 16 }
  0x21   :  { %259 = vmatpush3.msra.mxu0 %v62_v3  ;;  %v143_v23 = vld [vmem:[%s425_s3] sm:$0x1]  ;;  %p342_p10 = scmp.ne.s32.totalorder %s225_s10, %s341_s2  ;;  %p347_p12 = scmp.lt.s32.totalorder %s345_s11, %s341_s2 }
  0x22   :  { %260 = vmatprep.subr.mxu0 %v371_v0 }
  0x23   :  { %261 = vmatpush3.msra.mxu0 %v61_v4  ;;  %p348_p13 = por %p347_p12, %p346_p11 }
  0x24   :  { %262 = vmatprep.subr.mxu0 %v371_v0 }
  0x25   :  { %263 = vmatpush3.msra.mxu0 %v60_v5  ;;  %p349_p0 = pnand %p348_p13, %p342_p10 }
  0x26   :  { %264 = vmatprep.subr.mxu0 %v371_v0 }
  0x27   :  { %265 = vmatpush3.msra.mxu0 %v59_v6 }
  0x28   :  { %266 = vmatprep.subr.mxu0 %v371_v0 }
  0x29   :  { %267 = vmatpush3.msra.mxu0 %v58_v7 }
  0x2a   :  { %268 = vmatprep.subr.mxu0 %v371_v0 }
  0x2b   :  { %269 = vmatpush3.msra.mxu0 %v57_v8 }
  0x2c   :  { %270 = vmatprep.subr.mxu0 %v371_v0 }
  0x2d   :  { %271 = vmatpush3.msra.mxu0 %v56_v9 }
  0x2e   :  { %272 = vmatprep.subr.mxu0 %v371_v0 }
  0x2f   :  { %273 = vmatpush3.msra.mxu0 %v55_v10 }
  0x30   :  { %274 = vmatprep.subr.mxu0 %v371_v0 }
  0x31   :  { %275 = vmatpush3.msra.mxu0 %v54_v11 }
  0x32   :  { %276 = vmatprep.subr.mxu0 %v371_v0 }
  0x33   :  { %277 = vmatpush3.msra.mxu0 %v53_v12 }
  0x34   :  { %278 = vmatprep.subr.mxu0 %v371_v0 }
  0x35   :  { %279 = vmatpush3.msra.mxu0 %v52_v13 }
  0x36   :  { %280 = vmatprep.subr.mxu0 %v371_v0 }
  0x37   :  { %281 = vmatpush3.msra.mxu0 %v51_v14 }
  0x38   :  { %282 = vmatprep.subr.mxu0 %v371_v0 }
  0x39   :  { %283 = vmatpush3.msra.mxu0 %v50_v15 }
  0x3a   :  { %284 = vmatprep.subr.mxu0 %v371_v0 }
  0x3b   :  { %285 = vmatpush3.msra.mxu0 %v49_v16 }
  0x3c   :  { %287 = vmatmul.mubr.f32.vlgmr.msra.gmra.mxu0 %v48_v17 }
  0xfc   :  { %v138_v19 = vpop.f32.mrf.mxu0 }
  0xfd   :  { %v139_v20 = vadd.f32 %v234_v18, %v138_v19 }
  0xfe   :  { %v288_v21 = vpop.f32.mrf.mxu0 }
  0xff   :  { %v142_v22 = vmax.f32 %v139_v20, 0.0 }
 0x101   :  { %290 = vmatpush3.xpose.msra.mxu1 %v142_v22 }
 0x104   :  { %292 = vmatmul.mubr.f32.vlgmr.msra.gmra.mxu1 %v143_v23 }
 0x1c4   :  { %v212_v25 = vpop.f32.mrf.mxu1 }
 0x1c5   :  { %v213_v26 = vadd.f32 %v212_v25, %v145_v24 }
 0x1c6   :  { %v293_v27 = vpop.f32.mrf.mxu1 }
 0x1c7   :  { %217 = vst.msk [vmem:[#allocation8] sm:$0x1] %vm216_vm1, %v213_v26 }
 0x1c8   :  { %352 = shalt.err (!%p349_p0)
}
 0x1c9   :  { %227 = dma.vmem_to_hbm [thread:$0]  %s225_s10, 16, %s427_s5, [#allocation5]  }
 0x1ca   :  { %365 = dma.done.wait [#allocation5], 16  }
 0x1cb   :  { %366 = vsyncadd [#allocation5], 4294967280 }
 0x1cc   :  { %231 = vsyncpa [#allocation4], 1 }
 0x1cd   :  { %232 = vsyncpa [#allocation7], 1 }
 0x1ce   :  { %233 = vsyncpa [#allocation5], 1 }

// kernel: tpu_custom_call.1
= control target key start
LH: loop header
LB: loop body
LE: loop exit
PB: predicated region body
PF: predicated region fallthrough
CT: control target
= control target key end

     0   :  { %11 = vsyncpa [#allocation4], 0  ;;  %s422_s0 = inlined_call_operand.hbm [shape: f32[8,128], index: 0, kind: input, shape index: {}]   ;;  %s423_s1 = inlined_call_operand.hbm [shape: f32[128,128], index: 1, kind: input, shape index: {}]   ;;  %s424_s2 = inlined_call_operand.vmem [shape: f32[1,128], index: 2, kind: input, shape index: {}]   ;;  %s425_s3 = inlined_call_operand.vmem [shape: f32[1,128], index: 3, kind: input, shape index: {}]   ;;  %s426_s4 = inlined_call_operand.<no memory space> [shape: f32[1,1], index: 4, kind: input, shape index: {}]   ;;  %s427_s5 = inlined_call_operand.hbm [shape: f32[1,8], index: 5, kind: output, shape index: {}]  }
   0x1   :  { %12 = vsyncpa [#allocation7], 0 }
   0x2   :  { %13 = vsyncpa [#allocation5], 0  ;;  %s367_s18 = smov [#allocation3]   ;;  %s368_s20 = smov [#allocation6]  }
   0x3   :  { %s20_s19 = sshll.u32 %s367_s18, 4  ;;  %s29_s21 = sshll.u32 %s368_s20, 4  ;;  %s21_s19 = int_to_ptr.vmem [resolvable:$true] %s20_s19  ;;  %s30_s21 = int_to_ptr.vmem [resolvable:$true] %s29_s21 }
   0x4   :  { %s309_s22 = scalar_lea.vmem %s21_s19, 128  ;;  %p314_p1 = scmp.lt.s32.totalorder %s21_s19, %s21_s19 }
   0x5   :  { %p310_p0 = scmp.ne.s32.totalorder %s21_s19, %s309_s22  ;;  %p315_p2 = scmp.lt.s32.totalorder %s309_s22, %s309_s22 }
   0x7   :  { %p316_p3 = por %p315_p2, %p314_p1 }
   0x9   :  { %p317_p4 = pnand %p316_p3, %p310_p0 }
   0xb   :  { %320 = shalt.err (!%p317_p4)
}
   0xc   :  { %23 = dma.hbm_to_vmem [thread:$0]  %s422_s0, 128, %s21_s19, [#allocation4]  }
   0xd   :  { %s329_s25 = scalar_lea.vmem %s30_s21, 2048  ;;  %p334_p6 = scmp.lt.s32.totalorder %s30_s21, %s30_s21 }
   0xe   :  { %p330_p5 = scmp.ne.s32.totalorder %s30_s21, %s329_s25  ;;  %p335_p7 = scmp.lt.s32.totalorder %s329_s25, %s329_s25 }
  0x10   :  { %p336_p8 = por %p335_p7, %p334_p6 }
  0x12   :  { %p337_p9 = pnand %p336_p8, %p330_p5 }
  0x14   :  { %340 = shalt.err (!%p337_p9)
}
  0x15   :  { %s369_s26 = smov 128   ;;  %s370_s27 = smov 8  }
  0x16   :  { %35 = dma.hbm_to_vmem [thread:$0]  %s423_s1, 2048, %s30_s21, [#allocation7], %s369_s26, %s369_s26, %s370_s27  }
  0x17   :  { %361 = dma.done.wait [#allocation4], 128  }
  0x18   :  { %362 = vsyncadd [#allocation4], 4294967168 }
  0x19   :  { %363 = dma.done.wait [#allocation7], 2048  }
  0x1a   :  { %364 = vsyncadd [#allocation7], 4294965248  ;;  %v371_v0 = vmov 0.0   ;;  %vm372_vm0 = vmmov 0   ;;  %v64_v1 = vld [vmem:[#allocation6 + $0x78] sm:$0xff]  ;;  %v63_v2 = vld [vmem:[#allocation6 + $0x70] sm:$0xff]  ;;  %v145_v24 = vstv %s426_s4 }
  0x1b   :  { %254 = vmatprep.subr.mxu0 %v371_v0  ;;  %286 = vmatprep.mubr.msk.f32.mxu0 %vm372_vm0, %v371_v0  ;;  %v62_v3 = vld [vmem:[#allocation6 + $0x68] sm:$0xff]  ;;  %v61_v4 = vld [vmem:[#allocation6 + $0x60] sm:$0xff]  ;;  %v60_v5 = vld [vmem:[#allocation6 + $0x58] sm:$0xff]  ;;  %s373_s9 = smov [#allocation8]   ;;  %vm216_vm1 = vcmask 57344  }
  0x1c   :  { %289 = vmatprep.subr.mxu1 %v371_v0  ;;  %291 = vmatprep.mubr.msk.f32.mxu1 %vm372_vm0, %v371_v0  ;;  %v59_v6 = vld [vmem:[#allocation6 + $0x50] sm:$0xff]  ;;  %v58_v7 = vld [vmem:[#allocation6 + $0x48] sm:$0xff]  ;;  %v57_v8 = vld [vmem:[#allocation6 + $0x40] sm:$0xff]  ;;  %s224_s10 = sshll.u32 %s373_s9, 4  ;;  %s225_s10 = int_to_ptr.vmem [resolvable:$true] %s224_s10 }
  0x1d   :  { %255 = vmatpush3.msra.mxu0 %v64_v1  ;;  %v56_v9 = vld [vmem:[#allocation6 + $0x38] sm:$0xff]  ;;  %v55_v10 = vld [vmem:[#allocation6 + $0x30] sm:$0xff]  ;;  %v54_v11 = vld [vmem:[#allocation6 + $0x28] sm:$0xff]  ;;  %s345_s11 = scalar_lea.vmem %s225_s10, 32  ;;  %p346_p11 = scmp.lt.s32.totalorder %s225_s10, %s225_s10 }
  0x1e   :  { %256 = vmatprep.subr.mxu0 %v371_v0  ;;  %v53_v12 = vld [vmem:[#allocation6 + $0x20] sm:$0xff]  ;;  %v52_v13 = vld [vmem:[#allocation6 + $0x18] sm:$0xff]  ;;  %v51_v14 = vld [vmem:[#allocation6 + $0x10] sm:$0xff] }
  0x1f   :  { %257 = vmatpush3.msra.mxu0 %v63_v2  ;;  %v50_v15 = vld [vmem:[#allocation6 + $0x8] sm:$0xff]  ;;  %v49_v16 = vld [vmem:[#allocation6] sm:$0xff]  ;;  %v48_v17 = vld [vmem:[#allocation3] sm:$0xff] }
  0x20   :  { %258 = vmatprep.subr.mxu0 %v371_v0  ;;  %v234_v18 = vld [vmem:[%s424_s2] ss:$0 sm:$0xff]  ;;  %s341_s2 = scalar_lea.vmem %s225_s10, 16 }
  0x21   :  { %259 = vmatpush3.msra.mxu0 %v62_v3  ;;  %v143_v23 = vld [vmem:[%s425_s3] sm:$0x1]  ;;  %p342_p10 = scmp.ne.s32.totalorder %s225_s10, %s341_s2  ;;  %p347_p12 = scmp.lt.s32.totalorder %s345_s11, %s341_s2 }
  0x22   :  { %260 = vmatprep.subr.mxu0 %v371_v0 }
  0x23   :  { %261 = vmatpush3.msra.mxu0 %v61_v4  ;;  %p348_p13 = por %p347_p12, %p346_p11 }
  0x24   :  { %262 = vmatprep.subr.mxu0 %v371_v0 }
  0x25   :  { %263 = vmatpush3.msra.mxu0 %v60_v5  ;;  %p349_p0 = pnand %p348_p13, %p342_p10 }
  0x26   :  { %264 = vmatprep.subr.mxu0 %v371_v0 }
  0x27   :  { %265 = vmatpush3.msra.mxu0 %v59_v6 }
  0x28   :  { %266 = vmatprep.subr.mxu0 %v371_v0 }
  0x29   :  { %267 = vmatpush3.msra.mxu0 %v58_v7 }
  0x2a   :  { %268 = vmatprep.subr.mxu0 %v371_v0 }
  0x2b   :  { %269 = vmatpush3.msra.mxu0 %v57_v8 }
  0x2c   :  { %270 = vmatprep.subr.mxu0 %v371_v0 }
  0x2d   :  { %271 = vmatpush3.msra.mxu0 %v56_v9 }
  0x2e   :  { %272 = vmatprep.subr.mxu0 %v371_v0 }
  0x2f   :  { %273 = vmatpush3.msra.mxu0 %v55_v10 }
  0x30   :  { %274 = vmatprep.subr.mxu0 %v371_v0 }
  0x31   :  { %275 = vmatpush3.msra.mxu0 %v54_v11 }
  0x32   :  { %276 = vmatprep.subr.mxu0 %v371_v0 }
  0x33   :  { %277 = vmatpush3.msra.mxu0 %v53_v12 }
  0x34   :  { %278 = vmatprep.subr.mxu0 %v371_v0 }
  0x35   :  { %279 = vmatpush3.msra.mxu0 %v52_v13 }
  0x36   :  { %280 = vmatprep.subr.mxu0 %v371_v0 }
  0x37   :  { %281 = vmatpush3.msra.mxu0 %v51_v14 }
  0x38   :  { %282 = vmatprep.subr.mxu0 %v371_v0 }
  0x39   :  { %283 = vmatpush3.msra.mxu0 %v50_v15 }
  0x3a   :  { %284 = vmatprep.subr.mxu0 %v371_v0 }
  0x3b   :  { %285 = vmatpush3.msra.mxu0 %v49_v16 }
  0x3c   :  { %287 = vmatmul.mubr.f32.vlgmr.msra.gmra.mxu0 %v48_v17 }
  0xfc   :  { %v138_v19 = vpop.f32.mrf.mxu0 }
  0xfd   :  { %v139_v20 = vadd.f32 %v234_v18, %v138_v19 }
  0xfe   :  { %v288_v21 = vpop.f32.mrf.mxu0 }
  0xff   :  { %v142_v22 = vmax.f32 %v139_v20, 0.0 }
 0x101   :  { %290 = vmatpush3.xpose.msra.mxu1 %v142_v22 }
 0x104   :  { %292 = vmatmul.mubr.f32.vlgmr.msra.gmra.mxu1 %v143_v23 }
 0x1c4   :  { %v212_v25 = vpop.f32.mrf.mxu1 }
 0x1c5   :  { %v213_v26 = vadd.f32 %v212_v25, %v145_v24 }
 0x1c6   :  { %v293_v27 = vpop.f32.mrf.mxu1 }
 0x1c7   :  { %217 = vst.msk [vmem:[#allocation8] sm:$0x1] %vm216_vm1, %v213_v26 }
 0x1c8   :  { %352 = shalt.err (!%p349_p0)
}
 0x1c9   :  { %227 = dma.vmem_to_hbm [thread:$0]  %s225_s10, 16, %s427_s5, [#allocation5]  }
 0x1ca   :  { %365 = dma.done.wait [#allocation5], 16  }
 0x1cb   :  { %366 = vsyncadd [#allocation5], 4294967280 }
 0x1cc   :  { %231 = vsyncpa [#allocation4], 1 }
 0x1cd   :  { %232 = vsyncpa [#allocation7], 1 }
 0x1ce   :  { %233 = vsyncpa [#allocation5], 1 }

</bundles_post_ra>
